<compile_context>
chip_gen: v5e
topology: v5e:2x2
jax: 0.10.0
libtpu: 0.0.40
codegen_flags: <defaults>
</compile_context>

<pallas_src>
import jax
import jax.numpy as jnp
from jax.experimental import pallas as pl
from jax.experimental.pallas import tpu as pltpu


GLOBAL_FEATURE_SIZE = 7
ENTRY_SIZE = 23
LAYER_NODE_SIZE = 128
LEAKINESS = 0.1


# ----------------------------------------------------------------------------
# Parameter construction (mirrors torch.nn.Sequential in __init__; unused in
# forward(), just as in the PyTorch module).
# ----------------------------------------------------------------------------
def init_global_model_params(key):
    """Deterministically build the global_mlp parameters (shapes only matter)."""
    def linear_params(key, fan_in, fan_out):
        kw, kb = jax.random.split(key)
        bound = 1.0 / jnp.sqrt(fan_in)
        w = jax.random.uniform(kw, (fan_in, fan_out), jnp.float32, -bound, bound)
        b = jax.random.uniform(kb, (fan_out,), jnp.float32, -bound, bound)
        return {"weight": w, "bias": b}

    def bn_params(n):
        return {
            "gamma": jnp.ones((n,), jnp.float32),
            "beta": jnp.zeros((n,), jnp.float32),
            "running_mean": jnp.zeros((n,), jnp.float32),
            "running_var": jnp.ones((n,), jnp.float32),
        }

    k1, k2, k3 = jax.random.split(key, 3)
    return {
        "bn0": bn_params(ENTRY_SIZE),
        "lin0": linear_params(k1, ENTRY_SIZE, LAYER_NODE_SIZE),
        "bn1": bn_params(LAYER_NODE_SIZE),
        "lin1": linear_params(k2, LAYER_NODE_SIZE, LAYER_NODE_SIZE),
        "bn2": bn_params(LAYER_NODE_SIZE),
        "lin2": linear_params(k3, LAYER_NODE_SIZE, GLOBAL_FEATURE_SIZE),
    }


# ----------------------------------------------------------------------------
# Fast path: the forward pass is literally `return u`.  Emitting nothing is
# strictly faster than any kernel (saves launch + DMA overhead on every
# generation), so this is the default wrapper.
# ----------------------------------------------------------------------------
def global_model_forward(params, x, edge_index, edge_attr, u, batch):
    """GlobalModel.forward: returns `u` unchanged (no kernel emitted)."""
    del params, x, edge_index, edge_attr, batch  # unused, like in PyTorch forward
    # TODO(synk): global_mlp is defined in __init__ but never invoked in
    # forward(); it is therefore not part of any kernel.
    return u


# ----------------------------------------------------------------------------
# Optional Pallas identity — only if a stable custom-call boundary is required.
# Grid-less call (no grid loop / pipeline scaffolding), whole-array VMEM blocks,
# and input/output aliasing so the copy is in-place / elidable.
# ----------------------------------------------------------------------------
def _identity_kernel(u_ref, out_ref):
    out_ref[...] = u_ref[...]


def global_model_forward_pallas(params, x, edge_index, edge_attr, u, batch):
    """Same semantics as global_model_forward, but through a minimal Pallas call."""
    del params, x, edge_index, edge_attr, batch  # unused, like in PyTorch forward
    return pl.pallas_call(
        _identity_kernel,
        out_shape=jax.ShapeDtypeStruct(u.shape, u.dtype),
        # Grid-less: whole array as a single block resident in VMEM.
        in_specs=[pl.BlockSpec(memory_space=pltpu.MemorySpace.VMEM)],
        out_specs=pl.BlockSpec(memory_space=pltpu.MemorySpace.VMEM),
        # Output aliases input buffer: no second HBM allocation, writeback elided.
        input_output_aliases={0: 0},
    )(u)


if __name__ == "__main__":
    key = jax.random.PRNGKey(0)
    k_params, k_x, k_edge, k_u = jax.random.split(key, 4)

    params = init_global_model_params(k_params)

    # Small synthetic graph-batch consistent with the module's conventions:
    num_graphs = 2
    num_nodes = 8
    num_edges = 12
    node_feat = ENTRY_SIZE          # 23
    edge_feat = 4

    x = jax.random.normal(k_x, (num_nodes, node_feat), jnp.float32)
    edge_index = jax.random.randint(k_edge, (2, num_edges), 0, num_nodes, jnp.int32)
    edge_attr = jax.random.normal(k_edge, (num_edges, edge_feat), jnp.float32)
    u = jax.random.normal(k_u, (num_graphs, GLOBAL_FEATURE_SIZE), jnp.float32)
    batch = jnp.concatenate(
        [jnp.zeros((num_nodes // 2,), jnp.int32),
         jnp.ones((num_nodes - num_nodes // 2,), jnp.int32)]
    )

    # Default (optimal) path: no kernel, just `u`.
    out_fast = global_model_forward(params, x, edge_index, edge_attr, u, batch)
    out_fast = jax.block_until_ready(out_fast)

    # Pallas identity path (run the kernel once for validation).
    out_pallas = global_model_forward_pallas(params, x, edge_index, edge_attr, u, batch)
    out_pallas = jax.block_until_ready(out_pallas)

    assert out_fast.shape == u.shape and out_fast.dtype == u.dtype
    assert out_pallas.shape == u.shape and out_pallas.dtype == u.dtype
    assert bool(jnp.allclose(out_fast, u)), "forward must return u unchanged"
    assert bool(jnp.allclose(out_pallas, u)), "pallas identity must return u unchanged"
    print("KERNEL_OK")
</pallas_src>

<mosaic_0001>
module attributes {stable_mosaic.version = 11 : i64} {
  func.func @_identity_kernel(%arg0: memref<2x7xf32, #tpu.memory_space<vmem>>, %arg1: memref<2x7xf32, #tpu.memory_space<vmem>>) attributes {dimension_semantics = [], scalar_prefetch = 0 : i64, scratch_operands = 0 : i64, tpu.core_type = #tpu.core_type<tc>} {
    %c0 = arith.constant 0 : index
    %c0_0 = arith.constant 0 : index
    %0 = vector.load %arg0[%c0, %c0_0] : memref<2x7xf32, #tpu.memory_space<vmem>>, vector<2x7xf32>
    %c0_1 = arith.constant 0 : index
    %c0_2 = arith.constant 0 : index
    %1 = vector.load %arg1[%c0_1, %c0_2] : memref<2x7xf32, #tpu.memory_space<vmem>>, vector<2x7xf32>
    tpu.vector_store %arg1[%c0_1, %c0_2], %0 {strides = array<i32>} : memref<2x7xf32, #tpu.memory_space<vmem>>, vector<2x7xf32>,
    return
  }
}

</mosaic_0001>

<bundles_post_ra>
// kernel: tpu_custom_call.1
= control target key start
LH: loop header
LB: loop body
LE: loop exit
PB: predicated region body
PF: predicated region fallthrough
CT: control target
= control target key end

     0   :  { %6 = vsyncpa [#allocation3], 0  ;;  %s115_s0 = inlined_call_operand.hbm [shape: f32[2,7], index: 0, kind: input, shape index: {}, may-alias: {0,1}]   ;;  %s116_s1 = inlined_call_operand.hbm [shape: f32[2,7], index: 1, kind: output, shape index: {}, may-alias: {0,1}]  }
   0x1   :  { %7 = vsyncpa [#allocation4], 0  ;;  %s13_s8 = sshll.u32 %s115_s0, 4  ;;  %s97_s9 = smov [#allocation2]   ;;  %s14_s8 = int_to_ptr.hbm [resolvable:$true] %s13_s8 }
   0x2   :  { %s15_s10 = sshll.u32 %s97_s9, 4  ;;  %s16_s10 = int_to_ptr.vmem [resolvable:$true] %s15_s10 }
   0x3   :  { %18 = dma.hbm_to_vmem [thread:$0]  %s14_s8, 32, %s16_s10, [#allocation3]  }
   0x4   :  { %93 = dma.done.wait [#allocation3], 32  }
   0x5   :  { %94 = vsyncadd [#allocation3], 4294967264  ;;  %s98_s11 = smov [#allocation5]   ;;  %s33_s15 = sshll.u32 %s116_s1, 4  ;;  %vm24_vm0 = vcmask 50176   ;;  %s34_s15 = int_to_ptr.hbm [resolvable:$true] %s33_s15 }
   0x6   :  { %s31_s12 = sshll.u32 %s98_s11, 4  ;;  %v23_v0 = vld [vmem:[#allocation2] sm:$0x3]  ;;  %s32_s12 = int_to_ptr.vmem [resolvable:$true] %s31_s12 }
   0x7   :  { %25 = vst.msk [vmem:[#allocation5] sm:$0x3] %vm24_vm0, %v23_v0 }
   0x8   :  { %36 = dma.vmem_to_hbm [thread:$0]  %s32_s12, 32, %s34_s15, [#allocation4]  }
   0x9   :  { %95 = dma.done.wait [#allocation4], 32  }
   0xa   :  { %96 = vsyncadd [#allocation4], 4294967264 }
   0xb   :  { %41 = vsyncpa [#allocation3], 1 }
   0xc   :  { %42 = vsyncpa [#allocation4], 1 }

</bundles_post_ra>
